<compile_context>
chip_gen: v7x
topology: tpu7x:2x2x1
jax: 0.10.0
libtpu: 0.0.40
codegen_flags: <defaults>
</compile_context>

<pallas_src>
import functools

import jax
import jax.numpy as jnp
from jax.experimental import pallas as pl
from jax.experimental.pallas import tpu as pltpu

IN_CH = 3
HIDDEN = 32
NUM_HAND = 17
NUM_CLASSES = 2 * NUM_HAND        # 34
KSIZE = 3
KDIM = KSIZE * KSIZE * IN_CH      # 27


def _argmax_rows(x, idx):
    """First-occurrence argmax along axis 0. x:[C,N] f32, idx:[C,N] int32 iota -> [1,N]."""
    m = jnp.max(x, axis=0, keepdims=True)
    cand = jnp.where(x == m, idx, jnp.int32(NUM_CLASSES))
    return jnp.min(cand, axis=0, keepdims=True)


def _segm_kernel(x_ref, w1_ref, b1_ref, w2_ref, b2_ref,
                 logits_ref, mask_ref, *, w_pad):
    # x_ref:      [IN_CH, (H+3)*(W+2)] bf16  (flattened zero-padded image)
    # w1_ref:     [HIDDEN, KDIM]       bf16
    # b1_ref:     [HIDDEN, 1]          f32
    # w2_ref:     [NUM_CLASSES, HIDDEN] bf16
    # b2_ref:     [NUM_CLASSES, 1]     f32
    # logits_ref: [NUM_CLASSES, H*(W+2)] f32   (channel-major, pixels on lanes)
    # mask_ref:   [2, H*(W+2)]          int32  (row 0 = left hand, row 1 = right)
    npix = logits_ref.shape[-1]
    x = x_ref[...]
    w1 = w1_ref[...]

    # 3x3 'same' conv as 9 shifted lane-slices + MXU dots, accumulated in f32.
    h = None
    for t in range(KSIZE * KSIZE):
        di, dj = divmod(t, KSIZE)
        off = di * w_pad + dj
        x_tap = x[:, off:off + npix]                      # [IN_CH, npix] bf16
        w_tap = w1[:, t * IN_CH:(t + 1) * IN_CH]          # [HIDDEN, IN_CH] bf16
        acc = jnp.dot(w_tap, x_tap, preferred_element_type=jnp.float32)
        h = acc if h is None else h + acc
    h = jnp.maximum(h + b1_ref[...], 0.0)                 # [HIDDEN, npix] f32

    logits = jnp.dot(w2_ref[...], h.astype(jnp.bfloat16),
                     preferred_element_type=jnp.float32) + b2_ref[...]
    logits_ref[...] = logits                              # [NUM_CLASSES, npix] f32

    # map2labels: per-pixel argmax over the 17 channels of each hand (f32 values).
    idx = jax.lax.broadcasted_iota(jnp.int32, (NUM_HAND, npix), 0)
    mask_ref[0:1, :] = _argmax_rows(logits[:NUM_HAND, :], idx)
    mask_ref[1:2, :] = _argmax_rows(logits[NUM_HAND:, :], idx)


def init_params(key):
    k1, k2, k3, k4 = jax.random.split(key, 4)
    w1 = jax.random.normal(k1, (KDIM, HIDDEN), jnp.float32) * 0.1   # rows = (kh, kw, cin)
    b1 = jax.random.normal(k2, (HIDDEN,), jnp.float32) * 0.01
    w2 = jax.random.normal(k3, (HIDDEN, NUM_CLASSES), jnp.float32) * 0.1
    b2 = jax.random.normal(k4, (NUM_CLASSES,), jnp.float32) * 0.01
    return (w1, b1, w2, b2)


@jax.jit
def segm_model_forward(img_nchw, params):
    """Equivalent of Model.forward: returns segm masks + logits (NCHW)."""
    B, C, H, W = img_nchw.shape
    assert C == IN_CH
    w_pad = W + 2
    npix = H * w_pad            # output pixels incl. 2 junk columns per row
    np_in = (H + 3) * w_pad     # padded rows: 1 top + H + 2 bottom (slice slack)

    w1, b1, w2, b2 = params
    w1_k = jnp.transpose(w1).astype(jnp.bfloat16)          # [HIDDEN, KDIM]
    b1_k = b1.reshape(HIDDEN, 1).astype(jnp.float32)
    w2_k = jnp.transpose(w2).astype(jnp.bfloat16)          # [NUM_CLASSES, HIDDEN]
    b2_k = b2.reshape(NUM_CLASSES, 1).astype(jnp.float32)

    x = img_nchw.astype(jnp.bfloat16)
    xp = jnp.pad(x, ((0, 0), (0, 0), (1, 2), (1, 1)))      # [B, C, H+3, W+2]
    x_flat = xp.reshape(B, IN_CH, np_in)

    kernel = functools.partial(_segm_kernel, w_pad=w_pad)

    logits_flat, mask_flat = pl.pallas_call(
        kernel,
        out_shape=(
            jax.ShapeDtypeStruct((B, NUM_CLASSES, npix), jnp.float32),
            jax.ShapeDtypeStruct((B, 2, npix), jnp.int32),
        ),
        grid_spec=pltpu.PrefetchScalarGridSpec(
            num_scalar_prefetch=0,
            grid=(B,),
            in_specs=[
                pl.BlockSpec((None, IN_CH, np_in), lambda b: (b, 0, 0)),
                pl.BlockSpec((HIDDEN, KDIM), lambda b: (0, 0)),
                pl.BlockSpec((HIDDEN, 1), lambda b: (0, 0)),
                pl.BlockSpec((NUM_CLASSES, HIDDEN), lambda b: (0, 0)),
                pl.BlockSpec((NUM_CLASSES, 1), lambda b: (0, 0)),
            ],
            out_specs=[
                pl.BlockSpec((None, NUM_CLASSES, npix), lambda b: (b, 0, 0)),
                pl.BlockSpec((None, 2, npix), lambda b: (b, 0, 0)),
            ],
        ),
        compiler_params=pltpu.CompilerParams(
            dimension_semantics=("parallel",),
            vmem_limit_bytes=32 * 1024 * 1024),
    )(x_flat, w1_k, b1_k, w2_k, b2_k)

    # Kernel already wrote channel-major (NCHW) data; just drop the 2 padded columns.
    segm_logits = logits_flat.reshape(B, NUM_CLASSES, H, w_pad)[..., :W]
    masks = mask_flat.reshape(B, 2, H, w_pad)[..., :W]
    return {
        'segm_dict': {
            'segm_mask_l': masks[:, 0],
            'segm_mask_r': masks[:, 1],
            'segm_logits': segm_logits,
        }
    }


def model_wrapper_forward_test(inputs, meta_info, params):
    """Equivalent of ModelWrapper.forward_test (inference path)."""
    model_dict = segm_model_forward(inputs['img'], params)
    segm_dict = model_dict['segm_dict']
    im_path = [
        p.replace('./data/InterHand2.6M/images/', '').replace('.jpg', '')
        for p in meta_info['im_path']
    ]
    return {
        'segm_l': segm_dict['segm_mask_l'],
        'segm_r': segm_dict['segm_mask_r'],
        'im_path': im_path,
    }


# ----------------------------- validation helpers -----------------------------

def _im2col(x_nhwc):
    """3x3, stride 1, pad 1 patches; order (kh, kw, cin), cin fastest."""
    B, H, W, C = x_nhwc.shape
    xp = jnp.pad(x_nhwc, ((0, 0), (1, 1), (1, 1), (0, 0)))
    patches = jnp.stack(
        [xp[:, i:i + H, j:j + W, :] for i in range(KSIZE) for j in range(KSIZE)],
        axis=3)                                            # [B, H, W, 9, C]
    return patches.reshape(B * H * W, KDIM)


def _reference_logits(img_nchw, params):
    """Pure-JAX reference with matching bf16-matmul / f32-accumulate numerics."""
    w1, b1, w2, b2 = params
    x = jnp.transpose(img_nchw, (0, 2, 3, 1)).astype(jnp.bfloat16)   # NHWC bf16
    patches = _im2col(x)                                             # [N, 27] bf16
    h = jnp.dot(patches, w1.astype(jnp.bfloat16),
                preferred_element_type=jnp.float32) + b1
    h = jnp.maximum(h, 0.0)
    logits = jnp.dot(h.astype(jnp.bfloat16), w2.astype(jnp.bfloat16),
                     preferred_element_type=jnp.float32) + b2
    B, _, H, W = img_nchw.shape
    return logits.reshape(B, H, W, NUM_CLASSES).transpose(0, 3, 1, 2)


if __name__ == "__main__":
    key = jax.random.PRNGKey(0)
    pkey, xkey = jax.random.split(key)
    params = init_params(pkey)

    B, H, W = 2, 16, 16
    img = jax.random.normal(xkey, (B, IN_CH, H, W), jnp.float32)

    inputs = {'img': img}
    meta_info = {'im_path': ['./data/InterHand2.6M/images/test/a.jpg',
                             './data/InterHand2.6M/images/test/b.jpg']}

    out = model_wrapper_forward_test(inputs, meta_info, params)
    jax.block_until_ready(out['segm_l'])
    jax.block_until_ready(out['segm_r'])

    model_dict = segm_model_forward(img, params)
    kernel_logits = model_dict['segm_dict']['segm_logits']
    jax.block_until_ready(kernel_logits)

    # 1) logits vs pure-JAX reference (same bf16 matmul / f32 accumulate math)
    ref_logits = _reference_logits(img, params)
    assert kernel_logits.shape == (B, NUM_CLASSES, H, W)
    assert jnp.allclose(kernel_logits, ref_logits, atol=1e-2, rtol=1e-2)

    # 2) masks vs argmax of the kernel's own logits (validates map2labels exactly,
    #    including torch's first-occurrence tie behavior)
    ref_l = jnp.argmax(kernel_logits[:, :NUM_HAND], axis=1).astype(jnp.int32)
    ref_r = jnp.argmax(kernel_logits[:, NUM_HAND:], axis=1).astype(jnp.int32)
    assert out['segm_l'].shape == (B, H, W) and out['segm_r'].shape == (B, H, W)
    assert jnp.array_equal(out['segm_l'], ref_l)
    assert jnp.array_equal(out['segm_r'], ref_r)
    assert out['im_path'] == ['test/a', 'test/b']

    print("KERNEL_OK")
</pallas_src>

<mosaic_0001>
module attributes {stable_mosaic.version = 11 : i64} {
  func.func @_segm_kernel(%arg0: i32, %arg1: memref<1x3x342xbf16, #tpu.memory_space<vmem>>, %arg2: memref<32x27xbf16, #tpu.memory_space<vmem>>, %arg3: memref<32x1xf32, #tpu.memory_space<vmem>>, %arg4: memref<34x32xbf16, #tpu.memory_space<vmem>>, %arg5: memref<34x1xf32, #tpu.memory_space<vmem>>, %arg6: memref<1x34x288xf32, #tpu.memory_space<vmem>>, %arg7: memref<1x2x288xi32, #tpu.memory_space<vmem>>) attributes {dimension_semantics = [#tpu.dimension_semantics<parallel>], iteration_bounds = array<i64: 2>, scalar_prefetch = 0 : i64, scratch_operands = 0 : i64, tpu.core_type = #tpu.core_type<tc>, window_params = [{transform_indices = @transform_0, window_bounds = array<i64: 1, 3, 342>}, {pipeline_mode = #tpu.pipeline_mode<synchronous>, transform_indices = @transform_1, window_bounds = array<i64: 32, 27>}, {pipeline_mode = #tpu.pipeline_mode<synchronous>, transform_indices = @transform_2, window_bounds = array<i64: 32, 1>}, {pipeline_mode = #tpu.pipeline_mode<synchronous>, transform_indices = @transform_3, window_bounds = array<i64: 34, 32>}, {pipeline_mode = #tpu.pipeline_mode<synchronous>, transform_indices = @transform_4, window_bounds = array<i64: 34, 1>}, {transform_indices = @transform_5, window_bounds = array<i64: 1, 34, 288>}, {transform_indices = @transform_6, window_bounds = array<i64: 1, 2, 288>}]} {
    %c0 = arith.constant 0 : index
    %c0_0 = arith.constant 0 : index
    %c0_1 = arith.constant 0 : index
    %0 = vector.load %arg1[%c0, %c0_0, %c0_1] : memref<1x3x342xbf16, #tpu.memory_space<vmem>>, vector<1x3x342xbf16>
    %1 = vector.shape_cast %0 : vector<1x3x342xbf16> to vector<3x342xbf16>
    %c0_2 = arith.constant 0 : index
    %c0_3 = arith.constant 0 : index
    %2 = vector.load %arg2[%c0_2, %c0_3] : memref<32x27xbf16, #tpu.memory_space<vmem>>, vector<32x27xbf16>
    %3 = vector.extract_strided_slice %1 {offsets = [0, 0], sizes = [3, 288], strides = [1, 1]} : vector<3x342xbf16> to vector<3x288xbf16>
    %4 = vector.extract_strided_slice %2 {offsets = [0, 0], sizes = [32, 3], strides = [1, 1]} : vector<32x27xbf16> to vector<32x3xbf16>
    %cst = arith.constant dense<0.000000e+00> : vector<32x288xf32>
    %5 = tpu.matmul %4, %3, %cst {dimension_numbers = #tpu.dot_dimension_numbers<[1], [0], [0], [1], [0, 0, 1, 1], [], []>} : vector<32x3xbf16>, vector<3x288xbf16>, vector<32x288xf32> -> vector<32x288xf32>
    %6 = vector.extract_strided_slice %1 {offsets = [0, 1], sizes = [3, 288], strides = [1, 1]} : vector<3x342xbf16> to vector<3x288xbf16>
    %7 = vector.extract_strided_slice %2 {offsets = [0, 3], sizes = [32, 3], strides = [1, 1]} : vector<32x27xbf16> to vector<32x3xbf16>
    %cst_4 = arith.constant dense<0.000000e+00> : vector<32x288xf32>
    %8 = tpu.matmul %7, %6, %cst_4 {dimension_numbers = #tpu.dot_dimension_numbers<[1], [0], [0], [1], [0, 0, 1, 1], [], []>} : vector<32x3xbf16>, vector<3x288xbf16>, vector<32x288xf32> -> vector<32x288xf32>
    %9 = arith.addf %5, %8 : vector<32x288xf32>
    %10 = vector.extract_strided_slice %1 {offsets = [0, 2], sizes = [3, 288], strides = [1, 1]} : vector<3x342xbf16> to vector<3x288xbf16>
    %11 = vector.extract_strided_slice %2 {offsets = [0, 6], sizes = [32, 3], strides = [1, 1]} : vector<32x27xbf16> to vector<32x3xbf16>
    %cst_5 = arith.constant dense<0.000000e+00> : vector<32x288xf32>
    %12 = tpu.matmul %11, %10, %cst_5 {dimension_numbers = #tpu.dot_dimension_numbers<[1], [0], [0], [1], [0, 0, 1, 1], [], []>} : vector<32x3xbf16>, vector<3x288xbf16>, vector<32x288xf32> -> vector<32x288xf32>
    %13 = arith.addf %9, %12 : vector<32x288xf32>
    %14 = vector.extract_strided_slice %1 {offsets = [0, 18], sizes = [3, 288], strides = [1, 1]} : vector<3x342xbf16> to vector<3x288xbf16>
    %15 = vector.extract_strided_slice %2 {offsets = [0, 9], sizes = [32, 3], strides = [1, 1]} : vector<32x27xbf16> to vector<32x3xbf16>
    %cst_6 = arith.constant dense<0.000000e+00> : vector<32x288xf32>
    %16 = tpu.matmul %15, %14, %cst_6 {dimension_numbers = #tpu.dot_dimension_numbers<[1], [0], [0], [1], [0, 0, 1, 1], [], []>} : vector<32x3xbf16>, vector<3x288xbf16>, vector<32x288xf32> -> vector<32x288xf32>
    %17 = arith.addf %13, %16 : vector<32x288xf32>
    %18 = vector.extract_strided_slice %1 {offsets = [0, 19], sizes = [3, 288], strides = [1, 1]} : vector<3x342xbf16> to vector<3x288xbf16>
    %19 = vector.extract_strided_slice %2 {offsets = [0, 12], sizes = [32, 3], strides = [1, 1]} : vector<32x27xbf16> to vector<32x3xbf16>
    %cst_7 = arith.constant dense<0.000000e+00> : vector<32x288xf32>
    %20 = tpu.matmul %19, %18, %cst_7 {dimension_numbers = #tpu.dot_dimension_numbers<[1], [0], [0], [1], [0, 0, 1, 1], [], []>} : vector<32x3xbf16>, vector<3x288xbf16>, vector<32x288xf32> -> vector<32x288xf32>
    %21 = arith.addf %17, %20 : vector<32x288xf32>
    %22 = vector.extract_strided_slice %1 {offsets = [0, 20], sizes = [3, 288], strides = [1, 1]} : vector<3x342xbf16> to vector<3x288xbf16>
    %23 = vector.extract_strided_slice %2 {offsets = [0, 15], sizes = [32, 3], strides = [1, 1]} : vector<32x27xbf16> to vector<32x3xbf16>
    %cst_8 = arith.constant dense<0.000000e+00> : vector<32x288xf32>
    %24 = tpu.matmul %23, %22, %cst_8 {dimension_numbers = #tpu.dot_dimension_numbers<[1], [0], [0], [1], [0, 0, 1, 1], [], []>} : vector<32x3xbf16>, vector<3x288xbf16>, vector<32x288xf32> -> vector<32x288xf32>
    %25 = arith.addf %21, %24 : vector<32x288xf32>
    %26 = vector.extract_strided_slice %1 {offsets = [0, 36], sizes = [3, 288], strides = [1, 1]} : vector<3x342xbf16> to vector<3x288xbf16>
    %27 = vector.extract_strided_slice %2 {offsets = [0, 18], sizes = [32, 3], strides = [1, 1]} : vector<32x27xbf16> to vector<32x3xbf16>
    %cst_9 = arith.constant dense<0.000000e+00> : vector<32x288xf32>
    %28 = tpu.matmul %27, %26, %cst_9 {dimension_numbers = #tpu.dot_dimension_numbers<[1], [0], [0], [1], [0, 0, 1, 1], [], []>} : vector<32x3xbf16>, vector<3x288xbf16>, vector<32x288xf32> -> vector<32x288xf32>
    %29 = arith.addf %25, %28 : vector<32x288xf32>
    %30 = vector.extract_strided_slice %1 {offsets = [0, 37], sizes = [3, 288], strides = [1, 1]} : vector<3x342xbf16> to vector<3x288xbf16>
    %31 = vector.extract_strided_slice %2 {offsets = [0, 21], sizes = [32, 3], strides = [1, 1]} : vector<32x27xbf16> to vector<32x3xbf16>
    %cst_10 = arith.constant dense<0.000000e+00> : vector<32x288xf32>
    %32 = tpu.matmul %31, %30, %cst_10 {dimension_numbers = #tpu.dot_dimension_numbers<[1], [0], [0], [1], [0, 0, 1, 1], [], []>} : vector<32x3xbf16>, vector<3x288xbf16>, vector<32x288xf32> -> vector<32x288xf32>
    %33 = arith.addf %29, %32 : vector<32x288xf32>
    %34 = vector.extract_strided_slice %1 {offsets = [0, 38], sizes = [3, 288], strides = [1, 1]} : vector<3x342xbf16> to vector<3x288xbf16>
    %35 = vector.extract_strided_slice %2 {offsets = [0, 24], sizes = [32, 3], strides = [1, 1]} : vector<32x27xbf16> to vector<32x3xbf16>
    %cst_11 = arith.constant dense<0.000000e+00> : vector<32x288xf32>
    %36 = tpu.matmul %35, %34, %cst_11 {dimension_numbers = #tpu.dot_dimension_numbers<[1], [0], [0], [1], [0, 0, 1, 1], [], []>} : vector<32x3xbf16>, vector<3x288xbf16>, vector<32x288xf32> -> vector<32x288xf32>
    %37 = arith.addf %33, %36 : vector<32x288xf32>
    %c0_12 = arith.constant 0 : index
    %c0_13 = arith.constant 0 : index
    %38 = vector.load %arg3[%c0_12, %c0_13] : memref<32x1xf32, #tpu.memory_space<vmem>>, vector<32x1xf32>
    %39 = vector.broadcast %38 : vector<32x1xf32> to vector<32x288xf32>
    %40 = arith.addf %37, %39 : vector<32x288xf32>
    %cst_14 = arith.constant 0.000000e+00 : f32
    %41 = vector.broadcast %cst_14 : f32 to vector<32x288xf32>
    %42 = arith.maximumf %40, %41 : vector<32x288xf32>
    %c0_15 = arith.constant 0 : index
    %c0_16 = arith.constant 0 : index
    %43 = vector.load %arg4[%c0_15, %c0_16] : memref<34x32xbf16, #tpu.memory_space<vmem>>, vector<34x32xbf16>
    %44 = arith.truncf %42 : vector<32x288xf32> to vector<32x288xbf16>
    %cst_17 = arith.constant dense<0.000000e+00> : vector<34x288xf32>
    %45 = tpu.matmul %43, %44, %cst_17 {dimension_numbers = #tpu.dot_dimension_numbers<[1], [0], [0], [1], [0, 0, 1, 1], [], []>} : vector<34x32xbf16>, vector<32x288xbf16>, vector<34x288xf32> -> vector<34x288xf32>
    %c0_18 = arith.constant 0 : index
    %c0_19 = arith.constant 0 : index
    %46 = vector.load %arg5[%c0_18, %c0_19] : memref<34x1xf32, #tpu.memory_space<vmem>>, vector<34x1xf32>
    %47 = vector.broadcast %46 : vector<34x1xf32> to vector<34x288xf32>
    %48 = arith.addf %45, %47 : vector<34x288xf32>
    %c0_20 = arith.constant 0 : index
    %c0_21 = arith.constant 0 : index
    %c0_22 = arith.constant 0 : index
    %49 = vector.load %arg6[%c0_20, %c0_21, %c0_22] : memref<1x34x288xf32, #tpu.memory_space<vmem>>, vector<1x34x288xf32>
    %50 = vector.shape_cast %49 : vector<1x34x288xf32> to vector<34x288xf32>
    %51 = vector.shape_cast %48 : vector<34x288xf32> to vector<1x34x288xf32>
    tpu.vector_store %arg6[%c0_20, %c0_21, %c0_22], %51 {strides = array<i32>} : memref<1x34x288xf32, #tpu.memory_space<vmem>>, vector<1x34x288xf32>,
    %52 = tpu.iota {dimensions = array<i32: 0>} : vector<17x288xi32>
    %53 = vector.extract_strided_slice %48 {offsets = [0, 0], sizes = [17, 288], strides = [1, 1]} : vector<34x288xf32> to vector<17x288xf32>
    %cst_23 = arith.constant dense<0xFF800000> : vector<288xf32>
    %54 = vector.multi_reduction <maximumf>, %53, %cst_23 [0] : vector<17x288xf32> to vector<288xf32>
    %55 = vector.shape_cast %54 : vector<288xf32> to vector<1x288xf32>
    %56 = vector.broadcast %55 : vector<1x288xf32> to vector<17x288xf32>
    %57 = arith.cmpf oeq, %53, %56 : vector<17x288xf32>
    %c34_i32 = arith.constant 34 : i32
    %58 = vector.broadcast %c34_i32 : i32 to vector<17x288xi32>
    %59 = arith.select %57, %52, %58 : vector<17x288xi1>, vector<17x288xi32>
    %cst_24 = arith.constant dense<2147483647> : vector<288xi32>
    %60 = vector.multi_reduction <minsi>, %59, %cst_24 [0] : vector<17x288xi32> to vector<288xi32>
    %61 = vector.shape_cast %60 : vector<288xi32> to vector<1x288xi32>
    %c0_25 = arith.constant 0 : index
    %c0_26 = arith.constant 0 : index
    %c0_27 = arith.constant 0 : index
    %62 = vector.load %arg7[%c0_25, %c0_26, %c0_27] : memref<1x2x288xi32, #tpu.memory_space<vmem>>, vector<1x1x288xi32>
    %63 = vector.shape_cast %62 : vector<1x1x288xi32> to vector<1x288xi32>
    %64 = vector.shape_cast %61 : vector<1x288xi32> to vector<1x1x288xi32>
    tpu.vector_store %arg7[%c0_25, %c0_26, %c0_27], %64 {strides = array<i32>} : memref<1x2x288xi32, #tpu.memory_space<vmem>>, vector<1x1x288xi32>,
    %65 = vector.extract_strided_slice %48 {offsets = [17, 0], sizes = [17, 288], strides = [1, 1]} : vector<34x288xf32> to vector<17x288xf32>
    %cst_28 = arith.constant dense<0xFF800000> : vector<288xf32>
    %66 = vector.multi_reduction <maximumf>, %65, %cst_28 [0] : vector<17x288xf32> to vector<288xf32>
    %67 = vector.shape_cast %66 : vector<288xf32> to vector<1x288xf32>
    %68 = vector.broadcast %67 : vector<1x288xf32> to vector<17x288xf32>
    %69 = arith.cmpf oeq, %65, %68 : vector<17x288xf32>
    %c34_i32_29 = arith.constant 34 : i32
    %70 = vector.broadcast %c34_i32_29 : i32 to vector<17x288xi32>
    %71 = arith.select %69, %52, %70 : vector<17x288xi1>, vector<17x288xi32>
    %cst_30 = arith.constant dense<2147483647> : vector<288xi32>
    %72 = vector.multi_reduction <minsi>, %71, %cst_30 [0] : vector<17x288xi32> to vector<288xi32>
    %73 = vector.shape_cast %72 : vector<288xi32> to vector<1x288xi32>
    %c0_31 = arith.constant 0 : index
    %c1 = arith.constant 1 : index
    %c0_32 = arith.constant 0 : index
    %74 = vector.load %arg7[%c0_31, %c1, %c0_32] : memref<1x2x288xi32, #tpu.memory_space<vmem>>, vector<1x1x288xi32>
    %75 = vector.shape_cast %74 : vector<1x1x288xi32> to vector<1x288xi32>
    %76 = vector.shape_cast %73 : vector<1x288xi32> to vector<1x1x288xi32>
    tpu.vector_store %arg7[%c0_31, %c1, %c0_32], %76 {strides = array<i32>} : memref<1x2x288xi32, #tpu.memory_space<vmem>>, vector<1x1x288xi32>,
    return
  }
  func.func @transform_0(%arg0: i32) -> (i32, i32, i32) {
    %c0_i32 = arith.constant 0 : i32
    %c0_i32_0 = arith.constant 0 : i32
    %c0_i32_1 = arith.constant 0 : i32
    return %arg0, %c0_i32, %c0_i32_0 : i32, i32, i32
  }
  func.func @transform_1(%arg0: i32) -> (i32, i32) {
    %c0_i32 = arith.constant 0 : i32
    %c0_i32_0 = arith.constant 0 : i32
    %c0_i32_1 = arith.constant 0 : i32
    return %c0_i32, %c0_i32_0 : i32, i32
  }
  func.func @transform_2(%arg0: i32) -> (i32, i32) {
    %c0_i32 = arith.constant 0 : i32
    %c0_i32_0 = arith.constant 0 : i32
    %c0_i32_1 = arith.constant 0 : i32
    return %c0_i32, %c0_i32_0 : i32, i32
  }
  func.func @transform_3(%arg0: i32) -> (i32, i32) {
    %c0_i32 = arith.constant 0 : i32
    %c0_i32_0 = arith.constant 0 : i32
    %c0_i32_1 = arith.constant 0 : i32
    return %c0_i32, %c0_i32_0 : i32, i32
  }
  func.func @transform_4(%arg0: i32) -> (i32, i32) {
    %c0_i32 = arith.constant 0 : i32
    %c0_i32_0 = arith.constant 0 : i32
    %c0_i32_1 = arith.constant 0 : i32
    return %c0_i32, %c0_i32_0 : i32, i32
  }
  func.func @transform_5(%arg0: i32) -> (i32, i32, i32) {
    %c0_i32 = arith.constant 0 : i32
    %c0_i32_0 = arith.constant 0 : i32
    %c0_i32_1 = arith.constant 0 : i32
    return %arg0, %c0_i32, %c0_i32_0 : i32, i32, i32
  }
  func.func @transform_6(%arg0: i32) -> (i32, i32, i32) {
    %c0_i32 = arith.constant 0 : i32
    %c0_i32_0 = arith.constant 0 : i32
    %c0_i32_1 = arith.constant 0 : i32
    return %arg0, %c0_i32, %c0_i32_0 : i32, i32, i32
  }
}

</mosaic_0001>

<bundles_post_ra>
// kernel: segm_model_forward.1
= control target key start
LH: loop header
LB: loop body
LE: loop exit
PB: predicated region body
PF: predicated region fallthrough
CT: control target
= control target key end

     0   :  { %s2487_s21 = smov 0   ;;  %s2961_s0 = inlined_call_operand.vmem [shape: bf16[2,3,342], index: 0, kind: input, shape index: {}]   ;;  %s2962_s1 = inlined_call_operand.vmem [shape: bf16[32,27], index: 1, kind: input, shape index: {}]   ;;  %s2963_s2 = inlined_call_operand.vmem [shape: f32[32,1], index: 2, kind: input, shape index: {}]   ;;  %s2964_s3 = inlined_call_operand.vmem [shape: bf16[34,32], index: 3, kind: input, shape index: {}]   ;;  %s2965_s4 = inlined_call_operand.vmem [shape: f32[34,1], index: 4, kind: input, shape index: {}]   ;;  %s2966_s5 = inlined_call_operand.vmem [shape: f32[2,34,288], index: 5, kind: output, shape index: {0}]   ;;  %s2967_s6 = inlined_call_operand.vmem [shape: s32[2,2,288], index: 6, kind: output, shape index: {1}]  }
   0x1 LB: > { %s2128_s22 = sadd.s32 4294967295, %s2429_s21   ;;  %p2132_p0 = scmp.ge.s32.totalorder %s2429_s21, 1  ;;  %s2429_s21 = sphi %s2487_s21, %s17_s21  }
   0x2   : > { %p215_p1 = scmp.lt.s32.totalorder %s2429_s21, 3 }
   0x4   : > { %p216_p2 = pnand %p2132_p0, %p215_p1 }
   0x5   : > { %p250_p3 = scmp.lt.s32.totalorder (!%p216_p2), %s2128_s22, 1  ;;  %v290_v0 = vlaneseq (!%p216_p2)  ;;  %v2431_v1 = vmov (!%p216_p2), 1983009808   ;;  %vm318_vm0 = vcmask (!%p216_p2), 1040384   ;;  %vm319_vm1 = vcmask (!%p216_p2), 1041408   ;;  %s2434_s27 = smov (!%p216_p2), 126  }
   0x6   : > { %219 = sbr.rel (%p216_p2) target bundleno = 784 (0x310), region = 40  ;;  %v288_v2 = vunpack.c.l.s4 (!%p216_p2), %v2431_v1  ;;  %v2432_v6 = vmov (!%p216_p2), 65535   ;;  %v2433_v8 = vmov (!%p216_p2), 0   ;;  %v2523_v14 = vld [vmem:[%s2962_s1] sm:$0xff] (!%p216_p2)   ;;  %s2435_s30 = smov (!%p216_p2), 122   ;;  %vm311_vm2 = vcmask (!%p216_p2), 23552  }
   0x7   : > { %v2498_v3 = vshrl.u32 (!%p216_p2), %v290_v0, 7  ;;  %v320_v7 = vsel (!%p216_p2), %vm318_vm0, 4294967295, %v2432_v6  ;;  %480 = vmatprep.mubr.bf16.mxu0 (!%p216_p2), %v2433_v8  ;;  %363 = vmatprep.mubr.bf16.mxu1 (!%p216_p2), %v2433_v8  ;;  %v2535_v18 = vld [vmem:[%s2962_s1 + $0x8] sm:$0xff] (!%p216_p2)   ;;  %s2436_s9 = smov (!%p216_p2), 127   ;;  %s2437_s10 = smov (!%p216_p2), 110   ;;  %vm560_vm3 = vcmask (!%p216_p2), 1031168  }
   0x8   : > { %v289_v4 = vunpack.c.0.s8 (!%p216_p2), %v288_v2  ;;  %2415 = vset.pattern.permute.xlu0 (!%p216_p2), %v2433_v8  ;;  %2416 = vset.pattern.permute.xlu1 (!%p216_p2), %v2433_v8  ;;  %v2515_v12 = vsel (!%p216_p2), %vm319_vm1, %v320_v7, 0  ;;  %s2438_s11 = smov (!%p216_p2), 125   ;;  %s2439_s12 = smov (!%p216_p2), 119   ;;  %v1544_v24 = vld [vmem:[%s2963_s2] sm:$0xff] (!%p216_p2)  ;;  %v1545_v25 = vld [vmem:[%s2963_s2 + $0x8] sm:$0xff] (!%p216_p2)  ;;  %v1546_v29 = vld [vmem:[%s2963_s2 + $0x10] sm:$0xff] (!%p216_p2) }
   0x9   : > { %s2440_s13 = smov (!%p216_p2), 109   ;;  %s2441_s14 = smov (!%p216_p2), 116   ;;  %v1547_v31 = vld [vmem:[%s2963_s2 + $0x18] sm:$0xff] (!%p216_p2)  ;;  %vm308_vm4 = vcmask (!%p216_p2), 1039360   ;;  %v1605_v34 = vld [vmem:[%s2965_s4 + $0x10] sm:$0xff] (!%p216_p2)  ;;  %vm702_vm5 = vcmask (!%p216_p2), 900096  }
   0xa   : > { %v292_v5 = vsub.s32 (!%p216_p2), %v289_v4, %v2498_v3  ;;  %s2442_s15 = smov (!%p216_p2), 108   ;;  %s2443_s16 = smov (!%p216_p2), 113   ;;  %v1607_v35 = vld [vmem:[%s2965_s4 + $0x20] sm:$0x3] (!%p216_p2)  ;;  %v1604_v44 = vld [vmem:[%s2965_s4 + $0x8] sm:$0xff] (!%p216_p2)  ;;  %v1606_v51 = vld [vmem:[%s2965_s4 + $0x18] sm:$0xff] (!%p216_p2) }
   0xb   : > { %s2444_s17 = smov (!%p216_p2), 92   ;;  %s2445_s18 = smov (!%p216_p2), 91   ;;  %v1603_v43 = vld [vmem:[%s2965_s4] sm:$0xff] (!%p216_p2)  ;;  %vm844_vm6 = vcmask (!%p216_p2), 891904   ;;  %vm986_vm7 = vcmask (!%p216_p2), 883712   ;;  %vm1128_vm8 = vcmask (!%p216_p2), 752640  }
   0xc   : > { %s2446_s19 = smov (!%p216_p2), 107   ;;  %s2447_s20 = smov (!%p216_p2), 90   ;;  %vm1270_vm9 = vcmask (!%p216_p2), 744448   ;;  %vm1412_vm10 = vcmask (!%p216_p2), 736256   ;;  %vm1646_vm11 = vcmask (!%p216_p2), 261120   ;;  %vm2450_vm12 = vmmov (!%p216_p2), 0  }
   0xd   : > { %s2969_s22 = smov (!%p250_p3, %s2128_s22), 1  ;;  %s2448_s24 = smov 104   ;;  %vm1913_vm13 = vcmask 1047553  }
   0xe   : > { %s2384_s23 = smul.u32 6, %s2969_s22 }
   0xf   : > { %s2385_s28 = smul.u32 120, %s2969_s22 }
  0x10   : > { %s254_s26 = scalar_lea.vmem %s2961_s0, %s2384_s23 }
  0x11   : > { %v266_v9 = vld [vmem:[%s254_s26] sm:$0x3f]  ;;  %s2752_s7 = scalar_lea.vmem %s2966_s5, %s2385_s28 }
  0x12   : > { %v2512_v10 = vrot.slane %v266_v9, %v292_v5  ;;  %v286_v11 = vcombine.high %v266_v9, %v266_v9 }
  0x14   : > { %554 = vrot.lane.b32.xlu1 %v2512_v10, %s2434_s27  ;;  %v301_v13 = vcombine.high %v2512_v10, %v2512_v10  ;;  %v440_v15 = vand.u32 %v2515_v12, %v2512_v10  ;;  %v2527_v16 = vrot.slane %v286_v11, %v292_v5 }
  0x16   : > { %556 = vrot.lane.b32.xlu0 %v301_v13, %s2434_s27  ;;  %v443_v17 = vand.u32 %v2515_v12, %v301_v13  ;;  %v446_v49 = vand.u32 %v2515_v12, %v2527_v16 }
  0x18   : > { %550 = vrot.lane.b32.xlu1 %v2523_v14, %s2435_s30  ;;  %448 = vmatprep.subr.bf16.mxu0 %v443_v17 }
  0x19   : > { %449 = vmatpush1.bf16.msra.mxu0 %v440_v15 }
  0x1a   : > { %558 = vrot.lane.b32.xlu0 %v2527_v16, %s2434_s27 }
  0x1c   : > { %302 = vrot.lane.b32.xlu1 %v2512_v10, %s2436_s9  ;;  %2142 = vmatmul.mubr.msk.bf16.vlgmr.msra.gmra.mrb[0].mxu0 %vm311_vm2, %v2523_v14 }
  0x1d   : > { %490 = vmatprep.mubr.bf16.mxu0 %v2433_v8 }
  0x1e   : > { %552 = vrot.lane.b32.xlu0 %v2535_v18, %s2435_s30 }
  0x20   : > { %306 = vrot.lane.b32.xlu1 %v2527_v16, %s2436_s9 }
  0x22   : > { %304 = vrot.lane.b32.xlu0 %v301_v13, %s2436_s9 }
  0x24   : > { %700 = vrot.lane.b32.xlu1 %v2527_v16, %s2437_s10  ;;  %2143 = vmatmul.mubr.msk.bf16.gmra.mrb[4].mxu0 %vm311_vm2, %v2535_v18 }
  0x25   : > { %610 = vmatprep.mubr.bf16.mxu0 %v2433_v8 }
  0x26   : > { %698 = vrot.lane.b32.xlu0 %v301_v13, %s2437_s10 }
  0x28   : > { %281 = vrot.lane.b32.xlu1 %v2523_v14, %s2438_s11 }
  0x2a   : > { %696 = vrot.lane.b32.xlu0 %v2512_v10, %s2437_s10 }
  0x2c   : > { %283 = vrot.lane.b32.xlu1 %v2535_v18, %s2438_s11 }
  0x2e   : > { %692 = vrot.lane.b32.xlu0 %v2523_v14, %s2439_s12 }
  0x30   : > { %840 = vrot.lane.b32.xlu1 %v301_v13, %s2440_s13 }
  0x32   : > { %694 = vrot.lane.b32.xlu0 %v2535_v18, %s2439_s12 }
  0x34   : > { %838 = vrot.lane.b32.xlu1 %v2512_v10, %s2440_s13 }
  0x36   : > { %842 = vrot.lane.b32.xlu0 %v2527_v16, %s2440_s13 }
  0x38   : > { %836 = vrot.lane.b32.xlu1 %v2535_v18, %s2441_s14 }
  0x3a   : > { %834 = vrot.lane.b32.xlu0 %v2523_v14, %s2441_s14 }
  0x3c   : > { %984 = vrot.lane.b32.xlu1 %v2527_v16, %s2442_s15 }
  0x3e   : > { %982 = vrot.lane.b32.xlu0 %v301_v13, %s2442_s15 }
  0x40   : > { %976 = vrot.lane.b32.xlu1 %v2523_v14, %s2443_s16 }
  0x42   : > { %980 = vrot.lane.b32.xlu0 %v2512_v10, %s2442_s15 }
  0x44   : > { %1124 = vrot.lane.b32.xlu1 %v301_v13, %s2444_s17 }
  0x46   : > { %978 = vrot.lane.b32.xlu0 %v2535_v18, %s2443_s16 }
  0x48   : > { %1122 = vrot.lane.b32.xlu1 %v2512_v10, %s2444_s17 }
  0x4a   : > { %1126 = vrot.lane.b32.xlu0 %v2527_v16, %s2444_s17 }
  0x4c   : > { %1120 = vrot.lane.b32.xlu1 %v2535_v18, %s2437_s10 }
  0x4e   : > { %1118 = vrot.lane.b32.xlu0 %v2523_v14, %s2437_s10  ;;  %s264_s10 = scalar_lea.vmem %s2967_s6, %s2384_s23 }
  0x50   : > { %1268 = vrot.lane.b32.xlu1 %v2527_v16, %s2445_s18 }
  0x52   : > { %1266 = vrot.lane.b32.xlu0 %v301_v13, %s2445_s18 }
  0x54   : > { %1260 = vrot.lane.b32.xlu1 %v2523_v14, %s2446_s19 }
  0x56   : > { %1264 = vrot.lane.b32.xlu0 %v2512_v10, %s2445_s18 }
  0x58   : > { %1408 = vrot.lane.b32.xlu1 %v301_v13, %s2447_s20 }
  0x5a   : > { %1262 = vrot.lane.b32.xlu0 %v2535_v18, %s2446_s19 }
  0x5c   : > { %1406 = vrot.lane.b32.xlu1 %v2512_v10, %s2447_s20 }
  0x5e   : > { %1410 = vrot.lane.b32.xlu0 %v2527_v16, %s2447_s20 }
  0x60   : > { %1404 = vrot.lane.b32.xlu1 %v2535_v18, %s2448_s24 }
  0x62   : > { %1402 = vrot.lane.b32.xlu0 %v2523_v14, %s2448_s24 }
  0x64   : > { %1555 = vperm.xlu1 %2416, %v1545_v25  }
  0x66   : > { %1550 = vperm.xlu0 %2415, %v1544_v24  }
  0x68   : > { %1560 = vperm.xlu1 %2416, %v1546_v29  }
  0x6a   : > { %1565 = vperm.xlu0 %2415, %v1547_v31  }
  0x6c   : > { %1620 = vperm.xlu1 %2416, %v1605_v34  }
  0x6e   : > { %1630 = vperm.xlu0 %2415, %v1607_v35  }
  0x70   : > { %1610 = vperm.xlu1 %2416, %v1603_v43  }
  0x72   : > { %1615 = vperm.xlu0 %2415, %v1604_v44  }
  0x74   : > { %1625 = vperm.xlu1 %2416, %v1606_v51  }
  0x86   : > { %v555_v19 = vpop.permute.xlu1 %554 }
  0x88   : > { %v557_v20 = vpop.permute.xlu0 %556 }
  0x89   : > { %v561_v22 = vsel %vm560_vm3, %v555_v19, %v557_v20 }
  0x8a   : > { %v2577_v21 = vpop.permute.xlu1 %550  ;;  %v570_v30 = vand.u32 %v561_v22, %v2515_v12 }
  0x8c   : > { %v2579_v23 = vpop.permute.xlu0 %558 }
  0x8d   : > { %v562_v26 = vsel %vm560_vm3, %v557_v20, %v2579_v23  ;;  %v576_v2 = vand.u32 %v2579_v23, %v2515_v12 }
  0x8e   : > { %v573_v27 = vand.u32 %v562_v26, %v2515_v12  ;;  %v303_v28 = vpop.permute.xlu1 %302 }
  0x90   : > { %578 = vmatprep.subr.bf16.mxu0 %v573_v27  ;;  %v2596_v32 = vpop.permute.xlu0 %552 }
  0x91   : > { %579 = vmatpush1.bf16.msra.mxu0 %v570_v30 }
  0x92   : > { %v307_v33 = vpop.permute.xlu1 %306 }
  0x93   : > { %v329_v39 = vand.u32 %v2515_v12, %v307_v33 }
  0x94   : > { %2146 = vmatmul.mubr.msk.bf16.vlgmr.msra.gmra.mrb[0].mxu0 %vm311_vm2, %v2577_v21  ;;  %v305_v36 = vpop.permute.xlu0 %304 }
  0x95   : > { %v309_v37 = vsel %vm308_vm4, %v303_v28, %v305_v36  ;;  %v310_v38 = vsel %vm308_vm4, %v305_v36, %v307_v33  ;;  %620 = vmatprep.mubr.bf16.mxu0 %v2433_v8  ;;  %vm1813_vm4 = vcmask 253952  }
  0x96   : > { %v2608_v40 = vpop.permute.xlu1 %700  ;;  %v326_v41 = vand.u32 %v2515_v12, %v310_v38  ;;  %v323_v42 = vand.u32 %v2515_v12, %v309_v37 }
  0x98   : > { %331 = vmatprep.subr.bf16.mxu1 %v326_v41  ;;  %v699_v45 = vpop.permute.xlu0 %698 }
  0x99   : > { %v704_v46 = vsel %vm702_vm5, %v699_v45, %v2608_v40  ;;  %332 = vmatpush1.bf16.msra.mxu1 %v323_v42 }
  0x9a   : > { %v715_v47 = vand.u32 %v704_v46, %v2515_v12  ;;  %2218 = vmatprep.subr.bf16.mxu1 %v329_v39  ;;  %v282_v48 = vpop.permute.xlu1 %281 }
  0x9c   : > { %2138 = vmatmul.mubr.msk.bf16.vlgmr.msra.gmra.mrb[0].mxu1 %vm311_vm2, %v282_v48  ;;  %2147 = vmatmul.mubr.msk.bf16.gmra.mrb[4].mxu0 %vm311_vm2, %v2596_v32  ;;  %v697_v50 = vpop.permute.xlu0 %696 }
  0x9d   : > { %v703_v52 = vsel %vm702_vm5, %v697_v50, %v699_v45  ;;  %2219 = vmatpush3.bf16.msra.mxu1 %v329_v39  ;;  %720 = vmatprep.subr.bf16.mxu0 %v715_v47 }
  0x9e   : > { %v712_v53 = vand.u32 %v703_v52, %v2515_v12  ;;  %v284_v54 = vpop.permute.xlu1 %283  ;;  %373 = vmatprep.mubr.bf16.mxu1 %v2433_v8  ;;  %752 = vmatprep.mubr.bf16.mxu0 %v2433_v8 }
  0x9f   : > { %2224 = vmatprep.subr.bf16.mxu1 %v446_v49 }
  0xa0   : > { %721 = vmatpush1.bf16.msra.mxu0 %v712_v53  ;;  %v2633_v55 = vpop.permute.xlu0 %692 }
  0xa2   : > { %v841_v56 = vpop.permute.xlu1 %840 }
  0xa4   : > { %2139 = vmatmul.mubr.msk.bf16.gmra.mrb[4].mxu1 %vm311_vm2, %v284_v54  ;;  %2150 = vmatmul.mubr.msk.bf16.vlgmr.msra.gmra.mrb[0].mxu0 %vm311_vm2, %v2633_v55  ;;  %v2638_v57 = vpop.permute.xlu0 %694 }
  0xa5   : > { %2220 = vmatprep.mubr.msk.bf16.mxu1 %vm311_vm2, %v282_v48  ;;  %762 = vmatprep.mubr.bf16.mxu0 %v2433_v8 }
  0xa6   : > { %v839_v58 = vpop.permute.xlu1 %838 }
  0xa7   : > { %v845_v59 = vsel %vm844_vm6, %v839_v58, %v841_v56 }
  0xa8   : > { %v843_v60 = vpop.permute.xlu0 %842  ;;  %v854_v63 = vand.u32 %v845_v59, %v2515_v12 }
  0xa9   : > { %v846_v61 = vsel %vm844_vm6, %v841_v56, %v843_v60  ;;  %v860_v27 = vand.u32 %v843_v60, %v2515_v12 }
  0xaa   : > { %v857_v62 = vand.u32 %v846_v61, %v2515_v12  ;;  %v2644_v1 = vpop.permute.xlu1 %836 }
  0xac   : > { %2221 = vmatmul.mubr.msk.bf16.vlgmr.msra.gmra.mrb[8].mxu1 %vm311_vm2, %v284_v54  ;;  %2151 = vmatmul.mubr.msk.bf16.gmra.mrb[4].mxu0 %vm311_vm2, %v2638_v57  ;;  %v2651_v4 = vpop.permute.xlu0 %834 }
  0xad   : > { %2225 = vmatpush3.bf16.msra.mxu1 %v446_v49  ;;  %862 = vmatprep.subr.bf16.mxu0 %v857_v62 }
  0xae   : > { %2230 = vmatprep.subr.bf16.mxu1 %v576_v2  ;;  %863 = vmatpush1.bf16.msra.mxu0 %v854_v63  ;;  %v985_v5 = vpop.permute.xlu1 %984 }
  0xaf   : > { %894 = vmatprep.mubr.bf16.mxu0 %v2433_v8  ;;  %2226 = vmatprep.mubr.msk.bf16.mxu1 %vm311_vm2, %v2523_v14  ;;  %v718_v14 = vand.u32 %v2608_v40, %v2515_v12  ;;  %v1002_v35 = vand.u32 %v985_v5, %v2515_v12 }
  0xb0   : > { %v983_v6 = vpop.permute.xlu0 %982 }
  0xb1   : > { %v988_v7 = vsel %vm986_vm7, %v983_v6, %v985_v5 }
  0xb2   : > { %v999_v9 = vand.u32 %v988_v7, %v2515_v12  ;;  %v2657_v10 = vpop.permute.xlu1 %976 }
  0xb4   : > { %2154 = vmatmul.mubr.msk.bf16.vlgmr.msra.gmra.mrb[0].mxu0 %vm311_vm2, %v2651_v4  ;;  %v981_v11 = vpop.permute.xlu0 %980  ;;  %1004 = vmatprep.subr.bf16.mxu0 %v999_v9 }
  0xb5   : > { %v987_v13 = vsel %vm986_vm7, %v981_v11, %v983_v6  ;;  %904 = vmatprep.mubr.bf16.mxu0 %v2433_v8 }
  0xb6   : > { %v996_v15 = vand.u32 %v987_v13, %v2515_v12  ;;  %v1125_v16 = vpop.permute.xlu1 %1124 }
  0xb8   : > { %2227 = vmatmul.mubr.msk.bf16.vlgmr.msra.gmra.mrb[8].mxu1 %vm311_vm2, %v2535_v18  ;;  %1005 = vmatpush1.bf16.msra.mxu0 %v996_v15  ;;  %v2667_v17 = vpop.permute.xlu0 %978 }
  0xb9   : > { %2231 = vmatpush3.bf16.msra.mxu1 %v576_v2  ;;  %2232 = vmatprep.mubr.msk.bf16.mxu1 %vm311_vm2, %v2577_v21 }
  0xba   : > { %2236 = vmatprep.subr.bf16.mxu1 %v718_v14  ;;  %v1123_v19 = vpop.permute.xlu1 %1122 }
  0xbb   : > { %v1129_v24 = vsel %vm1128_vm8, %v1123_v19, %v1125_v16 }
  0xbc   : > { %2155 = vmatmul.mubr.msk.bf16.gmra.mrb[4].mxu0 %vm311_vm2, %v2644_v1  ;;  %v1127_v20 = vpop.permute.xlu0 %1126  ;;  %v1138_v21 = vand.u32 %v1129_v24, %v2515_v12 }
  0xbd   : > { %1036 = vmatprep.mubr.bf16.mxu0 %v2433_v8  ;;  %v1130_v22 = vsel %vm1128_vm8, %v1125_v16, %v1127_v20  ;;  %v1144_v42 = vand.u32 %v1127_v20, %v2515_v12 }
  0xbe   : > { %v1141_v23 = vand.u32 %v1130_v22, %v2515_v12  ;;  %v1121_v18 = vpop.permute.xlu1 %1120 }
  0xc0   : > { %1146 = vmatprep.subr.bf16.mxu0 %v1141_v23  ;;  %v1119_v25 = vpop.permute.xlu0 %1118 }
  0xc2   : > { %v1269_v26 = vpop.permute.xlu1 %1268 }
  0xc3   : > { %v1286_v45 = vand.u32 %v1269_v26, %v2515_v12 }
  0xc4   : > { %2158 = vmatmul.mubr.msk.bf16.vlgmr.msra.gmra.mrb[0].mxu0 %vm311_vm2, %v2657_v10  ;;  %2233 = vmatmul.mubr.msk.bf16.vlgmr.msra.gmra.mrb[8].mxu1 %vm311_vm2, %v2596_v32  ;;  %v1267_v28 = vpop.permute.xlu0 %1266 }
  0xc5   : > { %2237 = vmatpush3.bf16.msra.mxu1 %v718_v14  ;;  %2238 = vmatprep.mubr.msk.bf16.mxu1 %vm311_vm2, %v2633_v55  ;;  %v1272_v29 = vsel %vm1270_vm9, %v1267_v28, %v1269_v26 }
  0xc6   : > { %2242 = vmatprep.subr.bf16.mxu1 %v860_v27  ;;  %1046 = vmatprep.mubr.bf16.mxu0 %v2433_v8  ;;  %v1283_v30 = vand.u32 %v1272_v29, %v2515_v12  ;;  %v1261_v33 = vpop.permute.xlu1 %1260 }
  0xc7   : > { %1147 = vmatpush1.bf16.msra.mxu0 %v1138_v21 }
  0xc8   : > { %v1265_v31 = vpop.permute.xlu0 %1264  ;;  %1288 = vmatprep.subr.bf16.mxu0 %v1283_v30 }
  0xc9   : > { %v1271_v34 = vsel %vm1270_vm9, %v1265_v31, %v1267_v28 }
  0xca   : > { %v1409_v36 = vpop.permute.xlu1 %1408  ;;  %v1280_v38 = vand.u32 %v1271_v34, %v2515_v12 }
  0xcc   : > { %2159 = vmatmul.mubr.msk.bf16.gmra.mrb[4].mxu0 %vm311_vm2, %v2667_v17  ;;  %v1263_v32 = vpop.permute.xlu0 %1262 }
  0xcd   : > { %1178 = vmatprep.mubr.bf16.mxu0 %v2433_v8 }
  0xce   : > { %v1407_v41 = vpop.permute.xlu1 %1406 }
  0xcf   : > { %v1413_v43 = vsel %vm1412_vm10, %v1407_v41, %v1409_v36 }
  0xd0   : > { %2239 = vmatmul.mubr.msk.bf16.vlgmr.msra.gmra.mrb[8].mxu1 %vm311_vm2, %v2638_v57  ;;  %v1411_v37 = vpop.permute.xlu0 %1410  ;;  %v1422_v44 = vand.u32 %v1413_v43, %v2515_v12 }
  0xd1   : > { %2243 = vmatpush3.bf16.msra.mxu1 %v860_v27  ;;  %2244 = vmatprep.mubr.msk.bf16.mxu1 %vm311_vm2, %v2651_v4  ;;  %v1414_v39 = vsel %vm1412_vm10, %v1409_v36, %v1411_v37  ;;  %v1428_v47 = vand.u32 %v1411_v37, %v2515_v12  ;;  %v2420_v36 = vld [vmem:[%s2964_s3] sm:$0xff]   ;;  %v2449_v37 = vmov 0.0  }
  0xd2   : > { %2248 = vmatprep.subr.bf16.mxu1 %v1002_v35  ;;  %v1425_v40 = vand.u32 %v1414_v39, %v2515_v12  ;;  %v1405_v48 = vpop.permute.xlu1 %1404 }
  0xd4   : > { %2162 = vmatmul.mubr.msk.bf16.vlgmr.msra.gmra.mrb[0].mxu0 %vm311_vm2, %v1119_v25  ;;  %v1403_v46 = vpop.permute.xlu0 %1402 }
  0xd5   : > { %1188 = vmatprep.mubr.bf16.mxu0 %v2433_v8  ;;  %1289 = vmatpush1.bf16.msra.mxu0 %v1280_v38 }
  0xd6   : > { %1430 = vmatprep.subr.bf16.mxu0 %v1425_v40 }
  0xdc   : > { %2245 = vmatmul.mubr.msk.bf16.vlgmr.msra.gmra.mrb[8].mxu1 %vm311_vm2, %v2644_v1  ;;  %2163 = vmatmul.mubr.msk.bf16.gmra.mrb[4].mxu0 %vm311_vm2, %v1121_v18 }
  0xdd   : > { %2249 = vmatpush3.bf16.msra.mxu1 %v1002_v35  ;;  %2250 = vmatprep.mubr.msk.bf16.mxu1 %vm311_vm2, %v2657_v10 }
  0xde   : > { %2254 = vmatprep.subr.bf16.mxu1 %v1144_v42  ;;  %1320 = vmatprep.mubr.bf16.mxu0 %v2433_v8 }
  0xe3   : > { %v1556_v5 = vpop.permute.xlu1 %1555 }
  0xe4   : > { %2166 = vmatmul.mubr.msk.bf16.vlgmr.msra.gmra.mrb[0].mxu0 %vm311_vm2, %v1261_v33 }
  0xe5   : > { %1330 = vmatprep.mubr.bf16.mxu0 %v2433_v8  ;;  %1431 = vmatpush1.bf16.msra.mxu0 %v1422_v44  ;;  %v1551_v61 = vpop.permute.xlu0 %1550 }
  0xe7   : > { %v1561_v19 = vpop.permute.xlu1 %1560 }
  0xe8   : > { %2251 = vmatmul.mubr.msk.bf16.vlgmr.msra.gmra.mrb[8].mxu1 %vm311_vm2, %v2667_v17 }
  0xe9   : > { %2255 = vmatpush3.bf16.msra.mxu1 %v1144_v42  ;;  %2256 = vmatprep.mubr.msk.bf16.mxu1 %vm311_vm2, %v1119_v25  ;;  %v1566_v27 = vpop.permute.xlu0 %1565 }
  0xea   : > { %2260 = vmatprep.subr.bf16.mxu1 %v1286_v45 }
  0xec   : > { %2167 = vmatmul.mubr.msk.bf16.gmra.mrb[4].mxu0 %vm311_vm2, %v1263_v32 }
  0xed   : > { %1462 = vmatprep.mubr.bf16.mxu0 %v2433_v8 }
  0xf4   : > { %2257 = vmatmul.mubr.msk.bf16.vlgmr.msra.gmra.mrb[8].mxu1 %vm311_vm2, %v1121_v18  ;;  %2170 = vmatmul.mubr.msk.bf16.vlgmr.msra.gmra.mrb[0].mxu0 %vm311_vm2, %v1403_v46 }
  0xf5   : > { %2261 = vmatpush3.bf16.msra.mxu1 %v1286_v45  ;;  %2262 = vmatprep.mubr.msk.bf16.mxu1 %vm311_vm2, %v1261_v33 }
  0xf6   : > { %2266 = vmatprep.subr.bf16.mxu1 %v1428_v47  ;;  %1472 = vmatprep.mubr.bf16.mxu0 %v2433_v8 }
  0xfc   : > { %2171 = vmatmul.mubr.msk.bf16.gmra.mrb[4].mxu0 %vm311_vm2, %v1405_v48 }
 0x100   : > { %2263 = vmatmul.mubr.msk.bf16.vlgmr.msra.gmra.mrb[8].mxu1 %vm311_vm2, %v1263_v32 }
 0x101   : > { %2267 = vmatpush3.bf16.msra.mxu1 %v1428_v47  ;;  %2268 = vmatprep.mubr.msk.bf16.mxu1 %vm311_vm2, %v1403_v46  ;;  %v2421_v46 = vld [vmem:[%s2964_s3 + $0x8] sm:$0xff]  }
 0x10c   : > { %2269 = vmatmul.mubr.msk.bf16.vlgmr.msra.gmra.mrb[8].mxu1 %vm311_vm2, %v1405_v48 }
 0x10d   : > { %1688 = vmatprep.mubr.bf16.mxu1 %v2433_v8 }
 0x16f   : > { %v365_v12 = vpop.f32.mrb[0].mxu1 }
 0x170   : > { %v367_v49 = vpop.f32.mrb[1].mxu1 }
 0x171   : > { %v369_v50 = vpop.f32.mrb[2].mxu1 }
 0x172   : > { %v371_v51 = vpop.f32.mrb[3].mxu1 }
 0x177   : > { %v375_v52 = vpop.f32.mrb[4].mxu1 }
 0x178   : > { %v377_v53 = vpop.f32.mrb[5].mxu1 }
 0x179   : > { %v379_v54 = vpop.f32.mrb[6].mxu1 }
 0x17a   : > { %v381_v55 = vpop.f32.mrb[7].mxu1 }
 0x1c7   : > { %v1464_v56 = vpop.f32.mrb[0].mxu0 }
 0x1c8   : > { %v2288_v57 = vadd.f32 %v1464_v56, %v365_v12  ;;  %v1466_v58 = vpop.f32.mrb[1].mxu0 }
 0x1c9   : > { %v2289_v59 = vadd.f32 %v1466_v58, %v367_v49  ;;  %v1468_v60 = vpop.f32.mrb[2].mxu0 }
 0x1ca   : > { %v2290_v62 = vadd.f32 %v1468_v60, %v369_v50  ;;  %v1568_v63 = vadd.f32 %v2288_v57, %v1551_v61  ;;  %v1470_v1 = vpop.f32.mrb[3].mxu0 }
 0x1cb   : > { %v1569_v2 = vadd.f32 %v2289_v59, %v1551_v61  ;;  %v2291_v4 = vadd.f32 %v1470_v1, %v371_v51 }
 0x1cc   : > { %v1571_v6 = vadd.f32 %v2290_v62, %v1556_v5  ;;  %v1580_v9 = vmax.f32 %v1568_v63, 0.0 }
 0x1cd   : > { %v1572_v7 = vadd.f32 %v2291_v4, %v1556_v5  ;;  %v1581_v11 = vmax.f32 %v1569_v2, 0.0 }
 0x1ce   : > { %v1583_v10 = vmax.f32 %v1571_v6, 0.0 }
 0x1cf   : > { %v1584_v13 = vmax.f32 %v1572_v7, 0.0  ;;  %v1474_v15 = vpop.f32.mrb[4].mxu0 }
 0x1d0   : > { %v1597_v16 = vpack.c.bf16 %v1583_v10, %v1580_v9  ;;  %v2292_v14 = vadd.f32 %v1474_v15, %v375_v52  ;;  %v1476_v17 = vpop.f32.mrb[5].mxu0  ;;  %v2422_v52 = vld [vmem:[%s2964_s3 + $0x10] ss:$0 sps:$4 sm:$0x11]  }
 0x1d1   : > { %v2293_v20 = vadd.f32 %v1476_v17, %v377_v53  ;;  %v1478_v22 = vpop.f32.mrb[6].mxu0  ;;  %v1598_v23 = vpack.c.bf16 %v1584_v13, %v1581_v11  ;;  %v2747_v53 = vpop.permute.xlu0 %1630 }
 0x1d2   : > { %v1574_v18 = vadd.f32 %v2292_v14, %v1561_v19  ;;  %v2294_v24 = vadd.f32 %v1478_v22, %v379_v54  ;;  %v1480_v25 = vpop.f32.mrb[7].mxu0 }
 0x1d3   : > { %v1575_v26 = vadd.f32 %v2293_v20, %v1561_v19  ;;  %v2295_v21 = vadd.f32 %v1480_v25, %v381_v55  ;;  %1656 = vmatprep.subr.bf16.mxu1 %v1598_v23 }
 0x1d4   : > { %v1577_v28 = vadd.f32 %v2294_v24, %v1566_v27  ;;  %1657 = vmatpush1.bf16.msra.mxu1 %v1597_v16  ;;  %v1586_v30 = vmax.f32 %v1574_v18, 0.0 }
 0x1d5   : > { %v1578_v29 = vadd.f32 %v2295_v21, %v1566_v27  ;;  %v1587_v33 = vmax.f32 %v1575_v26, 0.0  ;;  %v2759_v58 = vpop.permute.xlu0 %1615 }
 0x1d6   : > { %v1589_v31 = vmax.f32 %v1577_v28, 0.0 }
 0x1d7   : > { %v1590_v32 = vmax.f32 %v1578_v29, 0.0 }
 0x1d8   : > { %v1600_v34 = vpack.c.bf16 %v1589_v31, %v1586_v30 }
 0x1d9   : > { %v1601_v35 = vpack.c.bf16 %v1590_v32, %v1587_v33 }
 0x1db   : > { %1658 = vmatprep.subr.bf16.mxu1 %v1601_v35 }
 0x1dc   : > { %1659 = vmatpush1.bf16.msra.mxu1 %v1600_v34 }
 0x1dd   : > { %2272 = vmatprep.subr.bf16.mxu1 %v2449_v37 }
 0x1df   : > { %v2270_v38 = vpop.f32.mrb[8].mxu1  ;;  %2177 = vmatmul.mubr.msk.bf16.vlgmr.msra.gmra.mrb[12].mxu1 %vm1646_vm11, %v2420_v36 }
 0x1e0   : > { %v1576_v39 = vadd.f32 %v2270_v38, %v1561_v19  ;;  %v1517_v40 = vpop.f32.mrb[9].mxu1  ;;  %1698 = vmatprep.mubr.bf16.mxu1 %v2433_v8 }
 0x1e1   : > { %v1570_v41 = vadd.f32 %v1551_v61, %v1517_v40  ;;  %v2271_v42 = vpop.f32.mrb[10].mxu1 }
 0x1e2   : > { %v1579_v43 = vadd.f32 %v2271_v42, %v1566_v27  ;;  %v1520_v44 = vpop.f32.mrb[11].mxu1  ;;  %v1588_v47 = vmax.f32 %v1576_v39, 0.0  ;;  %v2815_v27 = vadd.s32 8, %v2498_v3 }
 0x1e3   : > { %v1573_v45 = vadd.f32 %v1556_v5, %v1520_v44  ;;  %v1582_v12 = vmax.f32 %v1570_v41, 0.0  ;;  %v2834_v41 = vrot.slane %v2498_v3, 7 }
 0x1e4   : > { %v1591_v48 = vmax.f32 %v1579_v43, 0.0  ;;  %v1956_v42 = vrot.slane %v2815_v27, 7 }
 0x1e5   : > { %v1585_v49 = vmax.f32 %v1573_v45, 0.0 }
 0x1e6   : > { %v1602_v50 = vpack.c.bf16 %v1591_v48, %v1588_v47 }
 0x1e7   : > { %v1599_v51 = vpack.c.bf16 %v1585_v49, %v1582_v12  ;;  %2178 = vmatmul.mubr.msk.bf16.gmra.mrb[16].mxu1 %vm1646_vm11, %v2421_v46 }
 0x1e8   : > { %1708 = vmatprep.mubr.bf16.mxu1 %v2433_v8  ;;  %v2744_v8 = vpop.permute.xlu1 %1620 }
 0x1e9   : > { %2273 = vmatpush3.bf16.msra.mxu1 %v1599_v51 }
 0x1ea   : > { %2274 = vmatprep.subr.bf16.mxu1 %v2449_v37 }
 0x1ec   : > { %v2754_v54 = vpop.permute.xlu1 %1610 }
 0x1ed   : > { %2275 = vmatpush3.bf16.msra.mxu1 %v1602_v50 }
 0x1ef   : > { %2179 = vmatmul.mubr.msk.bf16.gmra.mrb[20].mxu1 %vm1646_vm11, %v2422_v52 }
 0x1f0   : > { %2276 = vmatprep.mubr.msk.bf16.mxu1 %vm2450_vm12, %v2449_v37  ;;  %v2781_v5 = vpop.permute.xlu1 %1625 }
 0x1f7   : > { %2277 = vmatmul.mubr.msk.bf16.vlgmr.msra.gmra.mrb[24].mxu1 %vm1646_vm11, %v2420_v36  ;;  %v2830_v36 = vadd.s32 16, %v2498_v3 }
 0x1f8   : > { %2280 = vmatprep.mubr.msk.bf16.mxu1 %vm2450_vm12, %v2449_v37 }
 0x1f9   : > { %v1958_v44 = vrot.slane %v2830_v36, 7 }
 0x1ff   : > { %2281 = vmatmul.mubr.msk.bf16.gmra.mrb[28].mxu1 %vm1646_vm11, %v2421_v46 }
 0x200   : > { %2284 = vmatprep.mubr.msk.bf16.mxu1 %vm2450_vm12, %v2449_v37 }
 0x207   : > { %2285 = vmatmul.mubr.msk.bf16.gmra.mrb[32].mxu1 %vm1646_vm11, %v2422_v52 }
 0x2b2   : > { %v1690_v55 = vpop.f32.mrb[12].mxu1 }
 0x2b3   : > { %v2757_v56 = vadd.f32 %v1690_v55, %v2754_v54  ;;  %v1692_v57 = vpop.f32.mrb[13].mxu1 }
 0x2b4   : > { %v2762_v59 = vadd.f32 %v1692_v57, %v2754_v54  ;;  %v1694_v60 = vpop.f32.mrb[14].mxu1  ;;  %v2844_v57 = vsel %vm318_vm0, %v2834_v41, %v1956_v42 }
 0x2b5   : > { %1773 = vst [vmem:[%s2752_s7] sm:$0xff] %v2757_v56  ;;  %v2767_v61 = vadd.f32 %v1694_v60, %v2759_v58  ;;  %v1696_v62 = vpop.f32.mrb[15].mxu1 }
 0x2b6   : > { %1774 = vst [vmem:[%s2752_s7 + $0x8] sm:$0xff] %v2762_v59  ;;  %v2772_v63 = vadd.f32 %v1696_v62, %v2759_v58 }
 0x2b7   : > { %1776 = vst [vmem:[%s2752_s7 + $0x18] sm:$0xff] %v2767_v61 }
 0x2b8   : > { %1777 = vst [vmem:[%s2752_s7 + $0x20] sm:$0xff] %v2772_v63 }
 0x2ba   : > { %v1700_v1 = vpop.f32.mrb[16].mxu1 }
 0x2bb   : > { %v2779_v2 = vadd.f32 %v1700_v1, %v2744_v8  ;;  %v1702_v4 = vpop.f32.mrb[17].mxu1  ;;  %v2847_v1 = vsel %vm318_vm0, %v1956_v42, %v1958_v44 }
 0x2bc   : > { %v2784_v6 = vadd.f32 %v1702_v4, %v2744_v8  ;;  %v1704_v7 = vpop.f32.mrb[18].mxu1 }
 0x2bd   : > { %1779 = vst [vmem:[%s2752_s7 + $0x30] sm:$0xff] %v2779_v2  ;;  %v1793_v9 = vsel %vm318_vm0, %v2779_v2, -inf  ;;  %v2791_v10 = vadd.f32 %v1704_v7, %v2781_v5  ;;  %v1706_v11 = vpop.f32.mrb[19].mxu1  ;;  %v1914_v29 = vsel %vm1913_vm13, %v2779_v2, -inf }
 0x2be   : > { %v1794_v13 = vmax.f32 %v2757_v56, %v1793_v9  ;;  %1780 = vst [vmem:[%s2752_s7 + $0x38] sm:$0xff] %v2784_v6  ;;  %v1802_v15 = vsel %vm318_vm0, %v2784_v6, -inf  ;;  %v2799_v16 = vadd.f32 %v1706_v11, %v2781_v5  ;;  %v1924_v34 = vsel %vm1913_vm13, %v2784_v6, -inf }
 0x2bf   : > { %v1803_v14 = vmax.f32 %v2762_v59, %v1802_v15  ;;  %1782 = vst [vmem:[%s2752_s7 + $0x48] sm:$0xff] %v2791_v10 }
 0x2c0   : > { %v1795_v17 = vmax.f32 %v1794_v13, %v2767_v61  ;;  %1783 = vst [vmem:[%s2752_s7 + $0x50] sm:$0xff] %v2799_v16 }
 0x2c1   : > { %v1804_v19 = vmax.f32 %v1803_v14, %v2772_v63 }
 0x2c2   : > { %v1796_v20 = vrot.slane %v1795_v17, 4  ;;  %v1710_v22 = vpop.f32.mrb[20].mxu1 }
 0x2c3   : > { %v1805_v23 = vrot.slane %v1804_v19, 4  ;;  %v2809_v18 = vadd.f32 %v1710_v22, %v2747_v53  ;;  %v1712_v24 = vpop.f32.mrb[21].mxu1 }
 0x2c4   : > { %v1797_v25 = vmax.f32 %v1795_v17, %v1796_v20  ;;  %v2812_v26 = vadd.f32 %v1712_v24, %v2747_v53  ;;  %v1714_v21 = vpop.f32.mrb[22].mxu1 }
 0x2c5   : > { %v1806_v28 = vmax.f32 %v1804_v19, %v1805_v23  ;;  %1785 = vst [vmem:[%s2752_s7 + $0x60] sm:$0x3] %v2809_v18  ;;  %v1915_v30 = vsel %vm319_vm1, %v2809_v18, -inf  ;;  %v1715_v31 = vpop.f32.mrb[23].mxu1 }
 0x2c6   : > { %v1798_v33 = vrot.slane %v1797_v25, 2  ;;  %v1916_v32 = vmax.f32 %v1914_v29, %v1915_v30  ;;  %1786 = vst [vmem:[%s2752_s7 + $0x68] sm:$0x3] %v2812_v26  ;;  %v1925_v35 = vsel %vm319_vm1, %v2812_v26, -inf }
 0x2c7   : > { %v1807_v37 = vrot.slane %v1806_v28, 2  ;;  %v1926_v38 = vmax.f32 %v1924_v34, %v1925_v35 }
 0x2c8   : > { %v1799_v39 = vmax.f32 %v1797_v25, %v1798_v33  ;;  %v1917_v40 = vmax.f32 %v1916_v32, %v2791_v10 }
 0x2c9   : > { %v1808_v43 = vmax.f32 %v1806_v28, %v1807_v37  ;;  %v1927_v45 = vmax.f32 %v1926_v38, %v2799_v16 }
 0x2ca   : > { %v1800_v46 = vrot.slane %v1799_v39, 1  ;;  %v1918_v47 = vrot.slane %v1917_v40, 4  ;;  %v1751_v48 = vpop.f32.mrb[24].mxu1 }
 0x2cb   : > { %v1809_v12 = vrot.slane %v1808_v43, 1  ;;  %v1928_v49 = vrot.slane %v1927_v45, 4  ;;  %v2840_v50 = vadd.f32 %v1751_v48, %v2754_v54  ;;  %v2278_v51 = vpop.f32.mrb[25].mxu1 }
 0x2cc   : > { %v1801_v52 = vmax.f32 %v1799_v39, %v1800_v46  ;;  %v1919_v55 = vmax.f32 %v1917_v40, %v1918_v47  ;;  %v1754_v60 = vpop.f32.mrb[26].mxu1 }
 0x2cd   : > { %v1810_v62 = vmax.f32 %v1808_v43, %v1809_v12  ;;  %v1929_v4 = vmax.f32 %v1927_v45, %v1928_v49  ;;  %1775 = vst.msk [vmem:[%s2752_s7 + $0x10] sm:$0xff] %vm1646_vm11, %v2840_v50  ;;  %v2853_v54 = vadd.f32 %v1754_v60, %v2759_v58  ;;  %v2279_v7 = vpop.f32.mrb[27].mxu1  ;;  %v1811_v17 = vsel %vm1646_vm11, %v2840_v50, -inf }
 0x2ce   : > { %vm1823_vm14 = vcmp.eq.f32.partialorder %v2757_v56, %v1801_v52  ;;  %vm1826_vm15 = vcmp.eq.f32.partialorder %v2767_v61, %v1801_v52  ;;  %vm1829_vm2 = vcmp.eq.f32.partialorder %v2779_v2, %v1801_v52  ;;  %v1920_v9 = vrot.slane %v1919_v55, 2 }
 0x2cf   : > { %v1832_v11 = vsel %vm1823_vm14, %v2498_v3, 34  ;;  %v1838_v13 = vsel %vm1829_vm2, %v2830_v36, 34  ;;  %vm1824_vm3 = vcmp.eq.f32.partialorder %v2762_v59, %v1810_v62  ;;  %1778 = vst.msk [vmem:[%s2752_s7 + $0x28] sm:$0xff] %vm1646_vm11, %v2853_v54  ;;  %vm1827_vm5 = vcmp.eq.f32.partialorder %v2772_v63, %v1810_v62 }
 0x2d0   : > { %v1841_v58 = vsel %vm318_vm0, %v1838_v13, 2147483647  ;;  %vm1830_vm6 = vcmp.eq.f32.partialorder %v2784_v6, %v1810_v62  ;;  %v1833_v56 = vsel %vm1824_vm3, %v2498_v3, 34  ;;  %v1921_v14 = vmax.f32 %v1919_v55, %v1920_v9 }
 0x2d1   : > { %vm1842_vm7 = vcmp.lt.s32.totalorder %v1832_v11, %v1841_v58  ;;  %v1839_v15 = vsel %vm1830_vm6, %v2830_v36, 34  ;;  %v1835_v59 = vsel %vm1826_vm15, %v2815_v27, 34  ;;  %v1930_v22 = vrot.slane %v1929_v4, 2 }
 0x2d2   : > { %v1843_v19 = vsel %vm1842_vm7, %v1832_v11, %v1841_v58  ;;  %v1855_v20 = vsel %vm318_vm0, %v1839_v15, 2147483647  ;;  %v1759_v23 = vpop.f32.mrb[28].mxu1  ;;  %v1922_v24 = vrot.slane %v1921_v14, 1  ;;  %v1836_v29 = vsel %vm1827_vm5, %v2815_v27, 34 }
 0x2d3   : > { %vm1844_vm8 = vcmp.lt.s32.totalorder %v1843_v19, %v1835_v59  ;;  %vm1856_vm9 = vcmp.lt.s32.totalorder %v1833_v56, %v1855_v20  ;;  %v2876_v25 = vadd.f32 %v1759_v23, %v2744_v8  ;;  %v2282_v21 = vpop.f32.mrb[29].mxu1  ;;  %v1931_v30 = vmax.f32 %v1929_v4, %v1930_v22 }
 0x2d4   : > { %v1845_v28 = vsel %vm1844_vm8, %v1843_v19, %v1835_v59  ;;  %v1857_v61 = vsel %vm1856_vm9, %v1833_v56, %v1855_v20  ;;  %v1762_v31 = vpop.f32.mrb[30].mxu1  ;;  %v1923_v32 = vmax.f32 %v1921_v14, %v1922_v24  ;;  %v1812_v43 = vsel %vm1646_vm11, %v2853_v54, -inf }
 0x2d5   : > { %v1846_v33 = vrot.slane %v1845_v28, 4  ;;  %vm1858_vm0 = vcmp.lt.s32.totalorder %v1857_v61, %v1836_v29  ;;  %1781 = vst.msk [vmem:[%s2752_s7 + $0x40] sm:$0xff] %vm1646_vm11, %v2876_v25  ;;  %v1814_v8 = vsel %vm1813_vm4, %v2876_v25, -inf  ;;  %v2283_v34 = vpop.f32.mrb[31].mxu1  ;;  %v1932_v37 = vrot.slane %v1931_v30, 1 }
 0x2d6   : > { %v1859_v35 = vsel %vm1858_vm0, %v1857_v61, %v1836_v29  ;;  %v1815_v38 = vmax.f32 %v1811_v17, %v1814_v8  ;;  %v2887_v63 = vadd.f32 %v1762_v31, %v2781_v5  ;;  %vm1946_vm12 = vcmp.eq.f32.partialorder %v2779_v2, %v1923_v32 }
 0x2d7   : > { %vm1847_vm10 = vcmp.lt.s32.totalorder %v1845_v28, %v1846_v33  ;;  %v1860_v39 = vrot.slane %v1859_v35, 4  ;;  %vm1949_vm14 = vcmp.eq.f32.partialorder %v2791_v10, %v1923_v32  ;;  %vm1952_vm15 = vcmp.eq.f32.partialorder %v2809_v18, %v1923_v32 }
 0x2d8   : > { %v1848_v40 = vsel %vm1847_vm10, %v1845_v28, %v1846_v33  ;;  %v1960_v42 = vsel %vm1946_vm12, %v2834_v41, 34  ;;  %1784 = vst.msk [vmem:[%s2752_s7 + $0x58] sm:$0xff] %vm1646_vm11, %v2887_v63  ;;  %vm1787_vm2 = vcmask 254976   ;;  %v1966_v44 = vsel %vm1952_vm15, %v2847_v1, 34 }
 0x2d9   : > { %v1849_v5 = vrot.slane %v1848_v40, 2  ;;  %vm1861_vm3 = vcmp.lt.s32.totalorder %v1859_v35, %v1860_v39  ;;  %v1969_v2 = vsel %vm1913_vm13, %v1960_v42, 2147483647  ;;  %vm1934_vm5 = vcmask 261121  }
 0x2da   : > { %v1862_v45 = vsel %vm1861_vm3, %v1859_v35, %v1860_v39  ;;  %v1970_v46 = vsel %vm319_vm1, %v1966_v44, 2147483647  ;;  %v1933_v18 = vmax.f32 %v1931_v30, %v1932_v37  ;;  %v1816_v47 = vmax.f32 %v1815_v38, %v1812_v43  ;;  %v1767_v48 = vpop.f32.mrb[32].mxu1 }
 0x2db   : > { %vm1850_vm6 = vcmp.lt.s32.totalorder %v1848_v40, %v1849_v5  ;;  %v1863_v12 = vrot.slane %v1862_v45, 2  ;;  %v1963_v49 = vsel %vm1949_vm14, %v2844_v57, 34  ;;  %vm1971_vm7 = vcmp.lt.s32.totalorder %v1969_v2, %v1970_v46  ;;  %v2286_v51 = vpop.f32.mrb[33].mxu1 }
 0x2dc   : > { %v1851_v52 = vsel %vm1850_vm6, %v1848_v40, %v1849_v5  ;;  %v1972_v55 = vsel %vm1971_vm7, %v1969_v2, %v1970_v46  ;;  %vm1947_vm8 = vcmp.eq.f32.partialorder %v2784_v6, %v1933_v18  ;;  %vm1950_vm9 = vcmp.eq.f32.partialorder %v2799_v16, %v1933_v18  ;;  %v1770_v60 = vpop.f32.mrb[34].mxu1 }
 0x2dd   : > { %v1852_v62 = vrot.slane %v1851_v52, 1  ;;  %vm1864_vm0 = vcmp.lt.s32.totalorder %v1862_v45, %v1863_v12  ;;  %vm1973_vm10 = vcmp.lt.s32.totalorder %v1972_v55, %v1963_v49  ;;  %vm1953_vm12 = vcmp.eq.f32.partialorder %v2812_v26, %v1933_v18  ;;  %v2287_v4 = vpop.f32.mrb[35].mxu1 }
 0x2de   : > { %v1865_v7 = vsel %vm1864_vm0, %v1862_v45, %v1863_v12  ;;  %v1974_v9 = vsel %vm1973_vm10, %v1972_v55, %v1963_v49  ;;  %v1961_v10 = vsel %vm1947_vm8, %v2834_v41, 34  ;;  %v1964_v11 = vsel %vm1950_vm9, %v2844_v57, 34 }
 0x2df   : > { %vm1853_vm14 = vcmp.lt.s32.totalorder %v1851_v52, %v1852_v62  ;;  %v1866_v13 = vrot.slane %v1865_v7, 1  ;;  %v1975_v58 = vrot.slane %v1974_v9, 4  ;;  %v1967_v6 = vsel %vm1953_vm12, %v2847_v1, 34 }
 0x2e0   : > { %v2910_v16 = vsel %vm1853_vm14, %v1851_v52, %v1852_v62  ;;  %v1984_v56 = vsel %vm1913_vm13, %v1961_v10, 2147483647  ;;  %v1985_v15 = vsel %vm319_vm1, %v1967_v6, 2147483647  ;;  %v1817_v26 = vrot.slane %v1816_v47, 4 }
 0x2e1   : > { %vm1867_vm15 = vcmp.lt.s32.totalorder %v1865_v7, %v1866_v13  ;;  %vm1976_vm3 = vcmp.lt.s32.totalorder %v1974_v9, %v1975_v58  ;;  %vm1986_vm6 = vcmp.lt.s32.totalorder %v1984_v56, %v1985_v15  ;;  %v2915_v14 = vadd.f32 %v1767_v48, %v2747_v53 }
 0x2e2   : > { %v2917_v17 = vsel %vm1867_vm15, %v1865_v7, %v1866_v13  ;;  %v1977_v59 = vsel %vm1976_vm3, %v1974_v9, %v1975_v58  ;;  %v1987_v19 = vsel %vm1986_vm6, %v1984_v56, %v1985_v15  ;;  %v1818_v20 = vmax.f32 %v1816_v47, %v1817_v26 }
 0x2e3   : > { %v1885_v22 = vcombine.low %v2910_v16, %v2917_v17  ;;  %v1978_v23 = vrot.slane %v1977_v59, 2  ;;  %vm1988_vm7 = vcmp.lt.s32.totalorder %v1987_v19, %v1964_v11  ;;  %1788 = vst.msk [vmem:[%s2752_s7 + $0x70] sm:$0x3] %vm1787_vm2, %v2915_v14  ;;  %v1935_v28 = vsel %vm1934_vm5, %v2876_v25, -inf }
 0x2e4   : > { %v1989_v24 = vsel %vm1988_vm7, %v1987_v19, %v1964_v11  ;;  %v1819_v21 = vrot.slane %v1818_v20, 2  ;;  %v1937_v53 = vsel %vm1787_vm2, %v2915_v14, -inf  ;;  %v1936_v33 = vsel %vm1646_vm11, %v2887_v63, -inf }
 0x2e5   : > { %vm1979_vm1 = vcmp.lt.s32.totalorder %v1977_v59, %v1978_v23  ;;  %v1990_v29 = vrot.slane %v1989_v24, 4  ;;  %v1938_v61 = vmax.f32 %v1935_v28, %v1937_v53  ;;  %v2451_v51 = vmov 1966171168  }
 0x2e6   : > { %v1980_v30 = vsel %vm1979_vm1, %v1977_v59, %v1978_v23  ;;  %v1820_v31 = vmax.f32 %v1818_v20, %v1819_v21  ;;  %v1887_v52 = vunpack.c.l.s4 %v2451_v51 }
 0x2e7   : > { %v1981_v32 = vrot.slane %v1980_v30, 1  ;;  %vm1991_vm13 = vcmp.lt.s32.totalorder %v1989_v24, %v1990_v29  ;;  %v1939_v8 = vmax.f32 %v1938_v61, %v1936_v33 }
 0x2e8   : > { %v1992_v34 = vsel %vm1991_vm13, %v1989_v24, %v1990_v29  ;;  %v1821_v35 = vrot.slane %v1820_v31, 1  ;;  %v1888_v62 = vunpack.c.0.s8 %v1887_v52 }
 0x2e9   : > { %v1993_v37 = vrot.slane %v1992_v34, 2  ;;  %v1940_v38 = vrot.slane %v1939_v8, 4  ;;  %vm1982_vm8 = vcmp.lt.s32.totalorder %v1980_v30, %v1981_v32 }
 0x2ea   : > { %v1822_v39 = vmax.f32 %v1820_v31, %v1821_v35  ;;  %v1983_v45 = vsel %vm1982_vm8, %v1980_v30, %v1981_v32 }
 0x2eb   : > { %vm1994_vm9 = vcmp.lt.s32.totalorder %v1992_v34, %v1993_v37  ;;  %v1941_v40 = vmax.f32 %v1939_v8, %v1940_v38 }
 0x2ec   : > { %v1995_v42 = vsel %vm1994_vm9, %v1992_v34, %v1993_v37  ;;  %vm1825_vm0 = vcmp.eq.f32.partialorder %v2840_v50, %v1822_v39  ;;  %vm1828_vm10 = vcmp.eq.f32.partialorder %v2853_v54, %v1822_v39  ;;  %vm1831_vm12 = vcmp.eq.f32.partialorder %v2876_v25, %v1822_v39 }
 0x2ed   : > { %v1996_v43 = vrot.slane %v1995_v42, 1  ;;  %v1834_v5 = vsel %vm1825_vm0, %v2498_v3, 34  ;;  %v1837_v44 = vsel %vm1828_vm10, %v2815_v27, 34  ;;  %v1840_v2 = vsel %vm1831_vm12, %v2830_v36, 34 }
 0x2ee   : > { %v1869_v46 = vsel %vm1646_vm11, %v1834_v5, 2147483647  ;;  %v1871_v18 = vsel %vm1813_vm4, %v1840_v2, 2147483647  ;;  %v1942_v47 = vrot.slane %v1941_v40, 2 }
 0x2ef   : > { %vm1997_vm14 = vcmp.lt.s32.totalorder %v1995_v42, %v1996_v43  ;;  %vm1872_vm15 = vcmp.lt.s32.totalorder %v1869_v46, %v1871_v18  ;;  %v1870_v54 = vsel %vm1646_vm11, %v1837_v44, 2147483647 }
 0x2f0   : > { %v1998_v50 = vsel %vm1997_vm14, %v1995_v42, %v1996_v43  ;;  %v1873_v48 = vsel %vm1872_vm15, %v1869_v46, %v1871_v18  ;;  %v1943_v49 = vmax.f32 %v1941_v40, %v1942_v47 }
 0x2f1   : > { %v2015_v12 = vcombine.low %v1983_v45, %v1998_v50  ;;  %vm1874_vm3 = vcmp.lt.s32.totalorder %v1873_v48, %v1870_v54 }
 0x2f2   : > { %v1875_v27 = vsel %vm1874_vm3, %v1873_v48, %v1870_v54  ;;  %v1944_v36 = vrot.slane %v1943_v49, 1 }
 0x2f3   : > { %v1876_v55 = vrot.slane %v1875_v27, 4 }
 0x2f4   : > { %v1945_v60 = vmax.f32 %v1943_v49, %v1944_v36 }
 0x2f5   : > { %vm1877_vm6 = vcmp.lt.s32.totalorder %v1875_v27, %v1876_v55 }
 0x2f6   : > { %v1878_v4 = vsel %vm1877_vm6, %v1875_v27, %v1876_v55  ;;  %vm1948_vm4 = vcmp.eq.f32.partialorder %v2876_v25, %v1945_v60  ;;  %vm1951_vm7 = vcmp.eq.f32.partialorder %v2887_v63, %v1945_v60  ;;  %vm1954_vm1 = vcmp.eq.f32.partialorder %v2915_v14, %v1945_v60 }
 0x2f7   : > { %v1879_v7 = vrot.slane %v1878_v4, 2  ;;  %v1962_v9 = vsel %vm1948_vm4, %v2834_v41, 34  ;;  %v1965_v10 = vsel %vm1951_vm7, %v2844_v57, 34  ;;  %v1968_v11 = vsel %vm1954_vm1, %v2847_v1, 34 }
 0x2f8   : > { %v1999_v13 = vsel %vm1934_vm5, %v1962_v9, 2147483647  ;;  %v2001_v58 = vsel %vm1787_vm2, %v1968_v11, 2147483647  ;;  %v1891_v25 = vsub.s32 %v1888_v62, %v2498_v3  ;;  %v2000_v63 = vsel %vm1646_vm11, %v1965_v10, 2147483647 }
 0x2f9   : > { %vm1880_vm13 = vcmp.lt.s32.totalorder %v1878_v4, %v1879_v7  ;;  %vm2002_vm8 = vcmp.lt.s32.totalorder %v1999_v13, %v2001_v58  ;;  %vm1910_vm11 = vcmp.lt.s32.totalorder %v290_v0, 288 }
 0x2fa   : > { %v1881_v6 = vsel %vm1880_vm13, %v1878_v4, %v1879_v7  ;;  %v2003_v15 = vsel %vm2002_vm8, %v1999_v13, %v2001_v58  ;;  %v1892_v1 = vrot.slane %v1885_v22, %v1891_v25  ;;  %v2022_v17 = vrot.slane %v2015_v12, %v1891_v25 }
 0x2fb   : > { %v1882_v56 = vrot.slane %v1881_v6, 1  ;;  %vm2004_vm9 = vcmp.lt.s32.totalorder %v2003_v15, %v2000_v63 }
 0x2fc   : > { %v2005_v41 = vsel %vm2004_vm9, %v2003_v15, %v2000_v63 }
 0x2fd   : > { %vm1883_vm0 = vcmp.lt.s32.totalorder %v1881_v6, %v1882_v56  ;;  %v2006_v26 = vrot.slane %v2005_v41, 4 }
 0x2fe   : > { %v1884_v57 = vsel %vm1883_vm0, %v1881_v6, %v1882_v56 }
 0x2ff   : > { %v1899_v14 = vrot.slane %v1884_v57, %v1891_v25  ;;  %vm2007_vm2 = vcmp.lt.s32.totalorder %v2005_v41, %v2006_v26 }
 0x300   : > { %v2008_v19 = vsel %vm2007_vm2, %v2005_v41, %v2006_v26 }
 0x301   : > { %v1900_v59 = vcombine.low %v1892_v1, %v1899_v14  ;;  %v2009_v3 = vrot.slane %v2008_v19, 2 }
 0x303   : > { %v1907_v20 = vrot.slane %v1900_v59, %v1891_v25  ;;  %vm2010_vm5 = vcmp.lt.s32.totalorder %v2008_v19, %v2009_v3 }
 0x304   : > { %v2011_v23 = vsel %vm2010_vm5, %v2008_v19, %v2009_v3 }
 0x305   : > { %1912 = vst.msk [vmem:[%s264_s10] ss:$2 sm:$0x7] %vm1910_vm11, %v1907_v20  ;;  %v2012_v24 = vrot.slane %v2011_v23, 1 }
 0x307   : > { %vm2013_vm10 = vcmp.lt.s32.totalorder %v2011_v23, %v2012_v24 }
 0x308   : > { %v2014_v16 = vsel %vm2013_vm10, %v2011_v23, %v2012_v24 }
 0x309   : > { %v2029_v22 = vrot.slane %v2014_v16, %v1891_v25 }
 0x30b   : > { %v2030_v21 = vcombine.low %v2022_v17, %v2029_v22 }
 0x30d   : > { %v2037_v28 = vrot.slane %v2030_v21, %v1891_v25 }
 0x30f   : > { %2183 = vst.msk [vmem:[%s264_s10 + $0x1] ss:$2 sm:$0x7] %vm1910_vm11, %v2037_v28 }
 0x310 PF: > { %s17_s21 = sadd.s32 1, %s2429_s21  }
 0x311   : > { %p14_p4 = scmp.ge.s32.totalorder %s17_s21, 4  }
 0x313   :  { %16 = sbr.rel (!%p14_p4) target bundleno = 1 (0x1), region = 83 }

</bundles_post_ra>
